<compile_context>
chip_gen: v6e
topology: v6e:2x2x1
jax: 0.10.0
libtpu: 0.0.40
codegen_flags: <defaults>
</compile_context>

<pallas_src>
import functools

import jax
import jax.numpy as jnp
from jax import lax
from jax.experimental import pallas as pl
from jax.experimental.pallas import tpu as pltpu


# --------------------------------------------------------------------------
# Kernels
# --------------------------------------------------------------------------
def _vdp_fc_kernel(mu_ref, sigma_ref, w_ref, params_ref, muf_ref, sout_ref,
                   *, compute_dtype):
    """input_flag=False path: propagate mean and covariance for TB samples."""
    tb, in_f = mu_ref.shape          # (TB, IN)
    out_f = w_ref.shape[0]           # OUT

    mu = mu_ref[...]                 # (TB, IN)       f32
    s2 = sigma_ref[...]              # (TB*IN, IN)    f32  (Sigma stacked row-wise)
    w = w_ref[...]                   # (OUT, IN)      compute_dtype
    params = params_ref[...]         # (3, OUT)       f32
    b_row = params[0:1, :]           # bias
    sp_row = params[1:2, :]          # softplus(sigma_weight) (precomputed in wrapper)
    sb_row = params[2:3, :]          # sigma_bias

    # ---- mean path: one matmul for the whole TB block, contraction on IN ----
    mu_f = lax.dot_general(mu.astype(compute_dtype), w,
                           (((1,), (1,)), ((), ())),
                           preferred_element_type=jnp.float32)       # (TB, OUT)
    muf_ref[...] = (mu_f + b_row).astype(muf_ref.dtype)

    # ---- covariance path, step 1 for all TB samples at once ----
    #   a[b*IN + i, p] = sum_j Sigma[b, i, j] * W[p, j]
    a = lax.dot_general(s2.astype(compute_dtype), w,
                        (((1,), (1,)), ((), ())),
                        preferred_element_type=jnp.float32)          # (TB*IN, OUT)
    a = a.astype(compute_dtype)

    # Diagonal masks (iota + compare only; no f32 identity materialization).
    eye_in = (lax.broadcasted_iota(jnp.int32, (in_f, in_f), 0) ==
              lax.broadcasted_iota(jnp.int32, (in_f, in_f), 1))
    eye_out = (lax.broadcasted_iota(jnp.int32, (out_f, out_f), 0) ==
               lax.broadcasted_iota(jnp.int32, (out_f, out_f), 1))

    # ---- step 2 per sample: W @ (Sigma_b @ W^T) + diagonal term ----
    for b in range(tb):                                   # tb static -> unrolled
        a_b = a[b * in_f:(b + 1) * in_f, :]               # (IN, OUT)
        r_b = lax.dot_general(w, a_b, (((1,), (0,)), ((), ())),
                              preferred_element_type=jnp.float32)    # (OUT, OUT)
        s_b = s2[b * in_f:(b + 1) * in_f, :]              # (IN, IN)
        tr_b = jnp.sum(jnp.where(eye_in, s_b, 0.0))       # trace(Sigma_b)
        musq_b = jnp.sum(mu[b:b + 1, :] * mu[b:b + 1, :])  # ||mu_b||^2
        diag_b = sp_row * (tr_b + musq_b) + sb_row        # (1, OUT)
        sout_ref[b] = jnp.where(eye_out, r_b + diag_b, r_b).astype(sout_ref.dtype)


def _vdp_fc_input_kernel(mu_ref, w_ref, params_ref, muf_ref, sout_ref,
                         *, compute_dtype):
    """input_flag=True path: only mu is given; covariance built from ||mu||^2."""
    tb, _ = mu_ref.shape
    out_f = w_ref.shape[0]

    mu = mu_ref[...]                 # (TB, IN)
    w = w_ref[...]                   # (OUT, IN)
    params = params_ref[...]         # (3, OUT)
    b_row = params[0:1, :]
    sp_row = params[1:2, :]
    sb_row = params[2:3, :]

    mu_f = lax.dot_general(mu.astype(compute_dtype), w,
                           (((1,), (1,)), ((), ())),
                           preferred_element_type=jnp.float32)
    muf_ref[...] = (mu_f + b_row).astype(muf_ref.dtype)

    eye_out = (lax.broadcasted_iota(jnp.int32, (out_f, out_f), 0) ==
               lax.broadcasted_iota(jnp.int32, (out_f, out_f), 1))
    zeros_oo = jnp.zeros((out_f, out_f), jnp.float32)     # hoisted out of loop

    for b in range(tb):
        musq_b = jnp.sum(mu[b:b + 1, :] * mu[b:b + 1, :])
        diag_b = sp_row * musq_b + sb_row                 # (1, OUT)
        sout_ref[b] = jnp.where(eye_out, diag_b, zeros_oo).astype(sout_ref.dtype)


# --------------------------------------------------------------------------
# Tiling / wrapper helpers
# --------------------------------------------------------------------------
def _choose_tb(batch, in_f, out_f):
    """Samples per grid step: multiple of 8 when possible, VMEM-budgeted."""
    per_sample = 4 * (in_f * in_f + out_f * out_f + in_f + out_f)
    budget = 6 << 20                               # per-buffer-set block bytes
    cap = max(1, budget // per_sample)
    if batch <= 8:
        return max(1, min(batch, cap))
    tb = min(cap, batch, 32)                       # 32 caps the static unroll
    if tb >= 8:
        tb = (tb // 8) * 8
        # keep >= 2 grid steps so both v7x TensorCores get work
        while tb > 8 and -(-batch // tb) < 2:
            tb = max(8, ((tb // 2) // 8) * 8)
    return max(1, tb)


def _vmem_limit_bytes(tb, in_f, out_f):
    block_bytes = 4 * (tb * (in_f * in_f + in_f + out_f * out_f + out_f)
                       + out_f * in_f + 3 * out_f)
    # double-buffered blocks + matmul intermediates; stay under v7x's 64 MiB.
    return int(min(56 << 20, max(32 << 20, 4 * block_bytes)))


def _pad_rows(x, target):
    if x.shape[0] == target:
        return x
    pad_cfg = [(0, target - x.shape[0])] + [(0, 0)] * (x.ndim - 1)
    return jnp.pad(x, pad_cfg)


def _pack_params(bias, sigma_weight, sigma_bias, out_f):
    return jnp.stack([
        bias.reshape(out_f).astype(jnp.float32),
        jax.nn.softplus(sigma_weight.astype(jnp.float32)).reshape(out_f),
        sigma_bias.reshape(out_f).astype(jnp.float32),
    ])                                              # (3, OUT)


# --------------------------------------------------------------------------
# Public wrappers
# --------------------------------------------------------------------------
@functools.partial(jax.jit, static_argnames=("compute_dtype",))
def vdp_fully_connected(mu, sigma, weight, bias, sigma_weight, sigma_bias,
                        *, compute_dtype=jnp.float32):
    """input_flag=False forward.  mu:[B,IN], sigma:[B,IN,IN] -> ([B,OUT],[B,OUT,OUT])."""
    B, IN = mu.shape
    OUT = weight.shape[0]
    tb = _choose_tb(B, IN, OUT)
    b_pad = -(-B // tb) * tb
    grid = b_pad // tb

    mu_p = _pad_rows(mu.astype(jnp.float32), b_pad)                   # (Bp, IN)
    sigma_p = _pad_rows(sigma.astype(jnp.float32), b_pad).reshape(b_pad * IN, IN)
    w_c = weight.astype(compute_dtype)                                # (OUT, IN)
    params = _pack_params(bias, sigma_weight, sigma_bias, OUT)        # (3, OUT)

    kernel = functools.partial(_vdp_fc_kernel, compute_dtype=compute_dtype)
    grid_spec = pltpu.PrefetchScalarGridSpec(
        num_scalar_prefetch=0,
        grid=(grid,),
        in_specs=[
            pl.BlockSpec((tb, IN), lambda i: (i, 0)),          # mu block
            pl.BlockSpec((tb * IN, IN), lambda i: (i, 0)),     # sigma block (2-D)
            pl.BlockSpec((OUT, IN), lambda i: (0, 0)),         # weight (resident)
            pl.BlockSpec((3, OUT), lambda i: (0, 0)),          # packed params
        ],
        out_specs=[
            pl.BlockSpec((tb, OUT), lambda i: (i, 0)),
            pl.BlockSpec((tb, OUT, OUT), lambda i: (i, 0, 0)),
        ],
    )
    mu_f, sigma_out = pl.pallas_call(
        kernel,
        grid_spec=grid_spec,
        out_shape=(
            jax.ShapeDtypeStruct((b_pad, OUT), jnp.float32),
            jax.ShapeDtypeStruct((b_pad, OUT, OUT), jnp.float32),
        ),
        compiler_params=pltpu.CompilerParams(
            dimension_semantics=("parallel",),
            vmem_limit_bytes=_vmem_limit_bytes(tb, IN, OUT)),
    )(mu_p, sigma_p, w_c, params)
    return mu_f[:B], sigma_out[:B]


@functools.partial(jax.jit, static_argnames=("compute_dtype",))
def vdp_fully_connected_input(mu, weight, bias, sigma_weight, sigma_bias,
                              *, compute_dtype=jnp.float32):
    """input_flag=True forward.  mu:[B,IN] -> ([B,OUT],[B,OUT,OUT])."""
    B, IN = mu.shape
    OUT = weight.shape[0]
    tb = _choose_tb(B, IN, OUT)
    b_pad = -(-B // tb) * tb
    grid = b_pad // tb

    mu_p = _pad_rows(mu.astype(jnp.float32), b_pad)
    w_c = weight.astype(compute_dtype)
    params = _pack_params(bias, sigma_weight, sigma_bias, OUT)

    kernel = functools.partial(_vdp_fc_input_kernel, compute_dtype=compute_dtype)
    grid_spec = pltpu.PrefetchScalarGridSpec(
        num_scalar_prefetch=0,
        grid=(grid,),
        in_specs=[
            pl.BlockSpec((tb, IN), lambda i: (i, 0)),
            pl.BlockSpec((OUT, IN), lambda i: (0, 0)),
            pl.BlockSpec((3, OUT), lambda i: (0, 0)),
        ],
        out_specs=[
            pl.BlockSpec((tb, OUT), lambda i: (i, 0)),
            pl.BlockSpec((tb, OUT, OUT), lambda i: (i, 0, 0)),
        ],
    )
    mu_f, sigma_out = pl.pallas_call(
        kernel,
        grid_spec=grid_spec,
        out_shape=(
            jax.ShapeDtypeStruct((b_pad, OUT), jnp.float32),
            jax.ShapeDtypeStruct((b_pad, OUT, OUT), jnp.float32),
        ),
        compiler_params=pltpu.CompilerParams(
            dimension_semantics=("parallel",),
            vmem_limit_bytes=_vmem_limit_bytes(tb, IN, OUT)),
    )(mu_p, w_c, params)
    return mu_f[:B], sigma_out[:B]


# --------------------------------------------------------------------------
# Pure-JAX references (mirror the PyTorch forward)
# --------------------------------------------------------------------------
def reference_forward(mu, sigma, weight, bias, sigma_weight, sigma_bias):
    mu_f = mu @ weight.T + bias.reshape(1, -1)
    W = weight[None]
    wswt = jnp.matmul(jnp.matmul(W, sigma), jnp.transpose(W, (0, 2, 1)))
    tr = jnp.trace(sigma, axis1=1, axis2=2)[:, None]
    mu_sq = jnp.sum(mu * mu, axis=1, keepdims=True)
    sw = jax.nn.softplus(sigma_weight).reshape(1, -1)
    diag_vals = sw * (tr + mu_sq)
    sigma_out = (wswt + jax.vmap(jnp.diag)(diag_vals)
                 + jnp.diag(sigma_bias.reshape(-1))[None])
    return mu_f, sigma_out


def reference_forward_input(mu, weight, bias, sigma_weight, sigma_bias):
    mu_f = mu @ weight.T + bias.reshape(1, -1)
    mu_sq = jnp.sum(mu * mu, axis=1, keepdims=True)
    sw = jax.nn.softplus(sigma_weight).reshape(1, -1)
    diag_vals = sw * mu_sq
    sigma_out = (jax.vmap(jnp.diag)(diag_vals)
                 + jnp.diag(sigma_bias.reshape(-1))[None])
    return mu_f, sigma_out


if __name__ == "__main__":
    # Small shapes consistent with the module's FC forward (non-square IN/OUT
    # to exercise the index handling).
    B, IN, OUT = 5, 32, 24

    key = jax.random.PRNGKey(0)
    k_mu, k_sig, k_w, k_sw = jax.random.split(key, 4)

    # ---- deterministic parameter init (matches the module's __init__) ----
    weight = 0.1 * jax.random.normal(k_w, (OUT, IN), dtype=jnp.float32)   # N(0, 0.1)
    bias = jnp.full((OUT,), 0.0001, dtype=jnp.float32)                    # mean_bias
    sigma_weight = jax.random.uniform(k_sw, (1, OUT), dtype=jnp.float32,
                                      minval=-12.0, maxval=-2.2)          # U(-12,-2.2)
    sigma_bias = jnp.ones((OUT,), dtype=jnp.float32)                      # ones * bias(True)

    # ---- deterministic example inputs ----
    mu = jax.random.normal(k_mu, (B, IN), dtype=jnp.float32)
    A = 0.1 * jax.random.normal(k_sig, (B, IN, IN), dtype=jnp.float32)
    sigma = jnp.matmul(A, jnp.transpose(A, (0, 2, 1)))      # PSD covariance per sample

    # ---- run the Pallas kernels ----
    mu_f, sigma_out = vdp_fully_connected(mu, sigma, weight, bias,
                                          sigma_weight, sigma_bias)
    jax.block_until_ready((mu_f, sigma_out))

    mu_f_in, sigma_out_in = vdp_fully_connected_input(mu, weight, bias,
                                                      sigma_weight, sigma_bias)
    jax.block_until_ready((mu_f_in, sigma_out_in))

    # ---- correctness checks against the pure-JAX references ----
    ref_mu_f, ref_sigma_out = reference_forward(mu, sigma, weight, bias,
                                                sigma_weight, sigma_bias)
    assert jnp.allclose(mu_f, ref_mu_f, atol=1e-5, rtol=1e-5)
    assert jnp.allclose(sigma_out, ref_sigma_out, atol=1e-5, rtol=1e-5)

    ref_mu_f_in, ref_sigma_out_in = reference_forward_input(mu, weight, bias,
                                                            sigma_weight, sigma_bias)
    assert jnp.allclose(mu_f_in, ref_mu_f_in, atol=1e-5, rtol=1e-5)
    assert jnp.allclose(sigma_out_in, ref_sigma_out_in, atol=1e-5, rtol=1e-5)

    print("KERNEL_OK")
</pallas_src>

<mosaic_0001>
module attributes {stable_mosaic.version = 11 : i64} {
  func.func @_vdp_fc_kernel(%arg0: i32, %arg1: memref<5x32xf32, #tpu.memory_space<vmem>>, %arg2: memref<160x32xf32, #tpu.memory_space<vmem>>, %arg3: memref<24x32xf32, #tpu.memory_space<vmem>>, %arg4: memref<3x24xf32, #tpu.memory_space<vmem>>, %arg5: memref<5x24xf32, #tpu.memory_space<vmem>>, %arg6: memref<5x24x24xf32, #tpu.memory_space<vmem>>) attributes {dimension_semantics = [#tpu.dimension_semantics<parallel>], iteration_bounds = array<i64: 1>, scalar_prefetch = 0 : i64, scratch_operands = 0 : i64, tpu.core_type = #tpu.core_type<tc>, window_params = [{transform_indices = @transform_0, window_bounds = array<i64: 5, 32>}, {transform_indices = @transform_1, window_bounds = array<i64: 160, 32>}, {pipeline_mode = #tpu.pipeline_mode<synchronous>, transform_indices = @transform_2, window_bounds = array<i64: 24, 32>}, {pipeline_mode = #tpu.pipeline_mode<synchronous>, transform_indices = @transform_3, window_bounds = array<i64: 3, 24>}, {transform_indices = @transform_4, window_bounds = array<i64: 5, 24>}, {transform_indices = @transform_5, window_bounds = array<i64: 5, 24, 24>}]} {
    %c0 = arith.constant 0 : index
    %c0_0 = arith.constant 0 : index
    %0 = vector.load %arg1[%c0, %c0_0] : memref<5x32xf32, #tpu.memory_space<vmem>>, vector<5x32xf32>
    %c0_1 = arith.constant 0 : index
    %c0_2 = arith.constant 0 : index
    %1 = vector.load %arg2[%c0_1, %c0_2] : memref<160x32xf32, #tpu.memory_space<vmem>>, vector<160x32xf32>
    %c0_3 = arith.constant 0 : index
    %c0_4 = arith.constant 0 : index
    %2 = vector.load %arg3[%c0_3, %c0_4] : memref<24x32xf32, #tpu.memory_space<vmem>>, vector<24x32xf32>
    %c0_5 = arith.constant 0 : index
    %c0_6 = arith.constant 0 : index
    %3 = vector.load %arg4[%c0_5, %c0_6] : memref<3x24xf32, #tpu.memory_space<vmem>>, vector<3x24xf32>
    %4 = vector.extract_strided_slice %3 {offsets = [0, 0], sizes = [1, 24], strides = [1, 1]} : vector<3x24xf32> to vector<1x24xf32>
    %5 = vector.extract_strided_slice %3 {offsets = [1, 0], sizes = [1, 24], strides = [1, 1]} : vector<3x24xf32> to vector<1x24xf32>
    %6 = vector.extract_strided_slice %3 {offsets = [2, 0], sizes = [1, 24], strides = [1, 1]} : vector<3x24xf32> to vector<1x24xf32>
    %cst = arith.constant dense<0.000000e+00> : vector<5x24xf32>
    %7 = tpu.matmul %0, %2, %cst {dimension_numbers = #tpu.dot_dimension_numbers<[1], [1], [0], [0], [0, 0, 1, 0], [], []>} : vector<5x32xf32>, vector<24x32xf32>, vector<5x24xf32> -> vector<5x24xf32>
    %8 = vector.broadcast %4 : vector<1x24xf32> to vector<5x24xf32>
    %9 = arith.addf %7, %8 : vector<5x24xf32>
    %c0_7 = arith.constant 0 : index
    %c0_8 = arith.constant 0 : index
    %10 = vector.load %arg5[%c0_7, %c0_8] : memref<5x24xf32, #tpu.memory_space<vmem>>, vector<5x24xf32>
    tpu.vector_store %arg5[%c0_7, %c0_8], %9 {strides = array<i32>} : memref<5x24xf32, #tpu.memory_space<vmem>>, vector<5x24xf32>,
    %cst_9 = arith.constant dense<0.000000e+00> : vector<160x24xf32>
    %11 = tpu.matmul %1, %2, %cst_9 {dimension_numbers = #tpu.dot_dimension_numbers<[1], [1], [0], [0], [0, 0, 1, 0], [], []>} : vector<160x32xf32>, vector<24x32xf32>, vector<160x24xf32> -> vector<160x24xf32>
    %12 = tpu.iota {dimensions = array<i32: 0>} : vector<32x32xi32>
    %13 = tpu.iota {dimensions = array<i32: 1>} : vector<32x32xi32>
    %14 = arith.cmpi eq, %12, %13 : vector<32x32xi32>
    %15 = tpu.iota {dimensions = array<i32: 0>} : vector<24x24xi32>
    %16 = tpu.iota {dimensions = array<i32: 1>} : vector<24x24xi32>
    %17 = arith.cmpi eq, %15, %16 : vector<24x24xi32>
    %18 = vector.extract_strided_slice %11 {offsets = [0, 0], sizes = [32, 24], strides = [1, 1]} : vector<160x24xf32> to vector<32x24xf32>
    %cst_10 = arith.constant dense<0.000000e+00> : vector<24x24xf32>
    %19 = tpu.matmul %2, %18, %cst_10 {dimension_numbers = #tpu.dot_dimension_numbers<[1], [0], [0], [1], [0, 0, 1, 1], [], []>} : vector<24x32xf32>, vector<32x24xf32>, vector<24x24xf32> -> vector<24x24xf32>
    %20 = vector.extract_strided_slice %1 {offsets = [0, 0], sizes = [32, 32], strides = [1, 1]} : vector<160x32xf32> to vector<32x32xf32>
    %cst_11 = arith.constant 0.000000e+00 : f32
    %21 = vector.broadcast %cst_11 : f32 to vector<32x32xf32>
    %22 = arith.select %14, %20, %21 : vector<32x32xi1>, vector<32x32xf32>
    %23 = vector.shape_cast %22 : vector<32x32xf32> to vector<1x32x32xf32>
    %cst_12 = arith.constant dense<0.000000e+00> : vector<1xf32>
    %24 = vector.multi_reduction <add>, %23, %cst_12 [1, 2] : vector<1x32x32xf32> to vector<1xf32>
    %25 = vector.shape_cast %24 : vector<1xf32> to vector<1x1x1xf32>
    %26 = vector.extract %25[0, 0, 0] : f32 from vector<1x1x1xf32>
    %27 = vector.extract_strided_slice %0 {offsets = [0, 0], sizes = [1, 32], strides = [1, 1]} : vector<5x32xf32> to vector<1x32xf32>
    %28 = vector.extract_strided_slice %0 {offsets = [0, 0], sizes = [1, 32], strides = [1, 1]} : vector<5x32xf32> to vector<1x32xf32>
    %29 = arith.mulf %27, %28 : vector<1x32xf32>
    %30 = vector.shape_cast %29 : vector<1x32xf32> to vector<1x1x32xf32>
    %cst_13 = arith.constant dense<0.000000e+00> : vector<1xf32>
    %31 = vector.multi_reduction <add>, %30, %cst_13 [1, 2] : vector<1x1x32xf32> to vector<1xf32>
    %32 = vector.shape_cast %31 : vector<1xf32> to vector<1x1x1xf32>
    %33 = vector.extract %32[0, 0, 0] : f32 from vector<1x1x1xf32>
    %34 = arith.addf %26, %33 : f32
    %35 = vector.broadcast %34 : f32 to vector<1x24xf32>
    %36 = arith.mulf %5, %35 : vector<1x24xf32>
    %37 = arith.addf %36, %6 : vector<1x24xf32>
    %38 = vector.broadcast %37 : vector<1x24xf32> to vector<24x24xf32>
    %39 = arith.addf %19, %38 : vector<24x24xf32>
    %40 = arith.select %17, %39, %19 : vector<24x24xi1>, vector<24x24xf32>
    %c0_14 = arith.constant 0 : index
    %c0_15 = arith.constant 0 : index
    %c0_16 = arith.constant 0 : index
    %41 = vector.load %arg6[%c0_14, %c0_15, %c0_16] : memref<5x24x24xf32, #tpu.memory_space<vmem>>, vector<1x24x24xf32>
    %42 = vector.shape_cast %41 : vector<1x24x24xf32> to vector<24x24xf32>
    %43 = vector.shape_cast %40 : vector<24x24xf32> to vector<1x24x24xf32>
    tpu.vector_store %arg6[%c0_14, %c0_15, %c0_16], %43 {strides = array<i32>} : memref<5x24x24xf32, #tpu.memory_space<vmem>>, vector<1x24x24xf32>,
    %44 = vector.extract_strided_slice %11 {offsets = [32, 0], sizes = [32, 24], strides = [1, 1]} : vector<160x24xf32> to vector<32x24xf32>
    %cst_17 = arith.constant dense<0.000000e+00> : vector<24x24xf32>
    %45 = tpu.matmul %2, %44, %cst_17 {dimension_numbers = #tpu.dot_dimension_numbers<[1], [0], [0], [1], [0, 0, 1, 1], [], []>} : vector<24x32xf32>, vector<32x24xf32>, vector<24x24xf32> -> vector<24x24xf32>
    %46 = vector.extract_strided_slice %1 {offsets = [32, 0], sizes = [32, 32], strides = [1, 1]} : vector<160x32xf32> to vector<32x32xf32>
    %cst_18 = arith.constant 0.000000e+00 : f32
    %47 = vector.broadcast %cst_18 : f32 to vector<32x32xf32>
    %48 = arith.select %14, %46, %47 : vector<32x32xi1>, vector<32x32xf32>
    %49 = vector.shape_cast %48 : vector<32x32xf32> to vector<1x32x32xf32>
    %cst_19 = arith.constant dense<0.000000e+00> : vector<1xf32>
    %50 = vector.multi_reduction <add>, %49, %cst_19 [1, 2] : vector<1x32x32xf32> to vector<1xf32>
    %51 = vector.shape_cast %50 : vector<1xf32> to vector<1x1x1xf32>
    %52 = vector.extract %51[0, 0, 0] : f32 from vector<1x1x1xf32>
    %53 = vector.extract_strided_slice %0 {offsets = [1, 0], sizes = [1, 32], strides = [1, 1]} : vector<5x32xf32> to vector<1x32xf32>
    %54 = vector.extract_strided_slice %0 {offsets = [1, 0], sizes = [1, 32], strides = [1, 1]} : vector<5x32xf32> to vector<1x32xf32>
    %55 = arith.mulf %53, %54 : vector<1x32xf32>
    %56 = vector.shape_cast %55 : vector<1x32xf32> to vector<1x1x32xf32>
    %cst_20 = arith.constant dense<0.000000e+00> : vector<1xf32>
    %57 = vector.multi_reduction <add>, %56, %cst_20 [1, 2] : vector<1x1x32xf32> to vector<1xf32>
    %58 = vector.shape_cast %57 : vector<1xf32> to vector<1x1x1xf32>
    %59 = vector.extract %58[0, 0, 0] : f32 from vector<1x1x1xf32>
    %60 = arith.addf %52, %59 : f32
    %61 = vector.broadcast %60 : f32 to vector<1x24xf32>
    %62 = arith.mulf %5, %61 : vector<1x24xf32>
    %63 = arith.addf %62, %6 : vector<1x24xf32>
    %64 = vector.broadcast %63 : vector<1x24xf32> to vector<24x24xf32>
    %65 = arith.addf %45, %64 : vector<24x24xf32>
    %66 = arith.select %17, %65, %45 : vector<24x24xi1>, vector<24x24xf32>
    %c1 = arith.constant 1 : index
    %c0_21 = arith.constant 0 : index
    %c0_22 = arith.constant 0 : index
    %67 = vector.load %arg6[%c1, %c0_21, %c0_22] : memref<5x24x24xf32, #tpu.memory_space<vmem>>, vector<1x24x24xf32>
    %68 = vector.shape_cast %67 : vector<1x24x24xf32> to vector<24x24xf32>
    %69 = vector.shape_cast %66 : vector<24x24xf32> to vector<1x24x24xf32>
    tpu.vector_store %arg6[%c1, %c0_21, %c0_22], %69 {strides = array<i32>} : memref<5x24x24xf32, #tpu.memory_space<vmem>>, vector<1x24x24xf32>,
    %70 = vector.extract_strided_slice %11 {offsets = [64, 0], sizes = [32, 24], strides = [1, 1]} : vector<160x24xf32> to vector<32x24xf32>
    %cst_23 = arith.constant dense<0.000000e+00> : vector<24x24xf32>
    %71 = tpu.matmul %2, %70, %cst_23 {dimension_numbers = #tpu.dot_dimension_numbers<[1], [0], [0], [1], [0, 0, 1, 1], [], []>} : vector<24x32xf32>, vector<32x24xf32>, vector<24x24xf32> -> vector<24x24xf32>
    %72 = vector.extract_strided_slice %1 {offsets = [64, 0], sizes = [32, 32], strides = [1, 1]} : vector<160x32xf32> to vector<32x32xf32>
    %cst_24 = arith.constant 0.000000e+00 : f32
    %73 = vector.broadcast %cst_24 : f32 to vector<32x32xf32>
    %74 = arith.select %14, %72, %73 : vector<32x32xi1>, vector<32x32xf32>
    %75 = vector.shape_cast %74 : vector<32x32xf32> to vector<1x32x32xf32>
    %cst_25 = arith.constant dense<0.000000e+00> : vector<1xf32>
    %76 = vector.multi_reduction <add>, %75, %cst_25 [1, 2] : vector<1x32x32xf32> to vector<1xf32>
    %77 = vector.shape_cast %76 : vector<1xf32> to vector<1x1x1xf32>
    %78 = vector.extract %77[0, 0, 0] : f32 from vector<1x1x1xf32>
    %79 = vector.extract_strided_slice %0 {offsets = [2, 0], sizes = [1, 32], strides = [1, 1]} : vector<5x32xf32> to vector<1x32xf32>
    %80 = vector.extract_strided_slice %0 {offsets = [2, 0], sizes = [1, 32], strides = [1, 1]} : vector<5x32xf32> to vector<1x32xf32>
    %81 = arith.mulf %79, %80 : vector<1x32xf32>
    %82 = vector.shape_cast %81 : vector<1x32xf32> to vector<1x1x32xf32>
    %cst_26 = arith.constant dense<0.000000e+00> : vector<1xf32>
    %83 = vector.multi_reduction <add>, %82, %cst_26 [1, 2] : vector<1x1x32xf32> to vector<1xf32>
    %84 = vector.shape_cast %83 : vector<1xf32> to vector<1x1x1xf32>
    %85 = vector.extract %84[0, 0, 0] : f32 from vector<1x1x1xf32>
    %86 = arith.addf %78, %85 : f32
    %87 = vector.broadcast %86 : f32 to vector<1x24xf32>
    %88 = arith.mulf %5, %87 : vector<1x24xf32>
    %89 = arith.addf %88, %6 : vector<1x24xf32>
    %90 = vector.broadcast %89 : vector<1x24xf32> to vector<24x24xf32>
    %91 = arith.addf %71, %90 : vector<24x24xf32>
    %92 = arith.select %17, %91, %71 : vector<24x24xi1>, vector<24x24xf32>
    %c2 = arith.constant 2 : index
    %c0_27 = arith.constant 0 : index
    %c0_28 = arith.constant 0 : index
    %93 = vector.load %arg6[%c2, %c0_27, %c0_28] : memref<5x24x24xf32, #tpu.memory_space<vmem>>, vector<1x24x24xf32>
    %94 = vector.shape_cast %93 : vector<1x24x24xf32> to vector<24x24xf32>
    %95 = vector.shape_cast %92 : vector<24x24xf32> to vector<1x24x24xf32>
    tpu.vector_store %arg6[%c2, %c0_27, %c0_28], %95 {strides = array<i32>} : memref<5x24x24xf32, #tpu.memory_space<vmem>>, vector<1x24x24xf32>,
    %96 = vector.extract_strided_slice %11 {offsets = [96, 0], sizes = [32, 24], strides = [1, 1]} : vector<160x24xf32> to vector<32x24xf32>
    %cst_29 = arith.constant dense<0.000000e+00> : vector<24x24xf32>
    %97 = tpu.matmul %2, %96, %cst_29 {dimension_numbers = #tpu.dot_dimension_numbers<[1], [0], [0], [1], [0, 0, 1, 1], [], []>} : vector<24x32xf32>, vector<32x24xf32>, vector<24x24xf32> -> vector<24x24xf32>
    %98 = vector.extract_strided_slice %1 {offsets = [96, 0], sizes = [32, 32], strides = [1, 1]} : vector<160x32xf32> to vector<32x32xf32>
    %cst_30 = arith.constant 0.000000e+00 : f32
    %99 = vector.broadcast %cst_30 : f32 to vector<32x32xf32>
    %100 = arith.select %14, %98, %99 : vector<32x32xi1>, vector<32x32xf32>
    %101 = vector.shape_cast %100 : vector<32x32xf32> to vector<1x32x32xf32>
    %cst_31 = arith.constant dense<0.000000e+00> : vector<1xf32>
    %102 = vector.multi_reduction <add>, %101, %cst_31 [1, 2] : vector<1x32x32xf32> to vector<1xf32>
    %103 = vector.shape_cast %102 : vector<1xf32> to vector<1x1x1xf32>
    %104 = vector.extract %103[0, 0, 0] : f32 from vector<1x1x1xf32>
    %105 = vector.extract_strided_slice %0 {offsets = [3, 0], sizes = [1, 32], strides = [1, 1]} : vector<5x32xf32> to vector<1x32xf32>
    %106 = vector.extract_strided_slice %0 {offsets = [3, 0], sizes = [1, 32], strides = [1, 1]} : vector<5x32xf32> to vector<1x32xf32>
    %107 = arith.mulf %105, %106 : vector<1x32xf32>
    %108 = vector.shape_cast %107 : vector<1x32xf32> to vector<1x1x32xf32>
    %cst_32 = arith.constant dense<0.000000e+00> : vector<1xf32>
    %109 = vector.multi_reduction <add>, %108, %cst_32 [1, 2] : vector<1x1x32xf32> to vector<1xf32>
    %110 = vector.shape_cast %109 : vector<1xf32> to vector<1x1x1xf32>
    %111 = vector.extract %110[0, 0, 0] : f32 from vector<1x1x1xf32>
    %112 = arith.addf %104, %111 : f32
    %113 = vector.broadcast %112 : f32 to vector<1x24xf32>
    %114 = arith.mulf %5, %113 : vector<1x24xf32>
    %115 = arith.addf %114, %6 : vector<1x24xf32>
    %116 = vector.broadcast %115 : vector<1x24xf32> to vector<24x24xf32>
    %117 = arith.addf %97, %116 : vector<24x24xf32>
    %118 = arith.select %17, %117, %97 : vector<24x24xi1>, vector<24x24xf32>
    %c3 = arith.constant 3 : index
    %c0_33 = arith.constant 0 : index
    %c0_34 = arith.constant 0 : index
    %119 = vector.load %arg6[%c3, %c0_33, %c0_34] : memref<5x24x24xf32, #tpu.memory_space<vmem>>, vector<1x24x24xf32>
    %120 = vector.shape_cast %119 : vector<1x24x24xf32> to vector<24x24xf32>
    %121 = vector.shape_cast %118 : vector<24x24xf32> to vector<1x24x24xf32>
    tpu.vector_store %arg6[%c3, %c0_33, %c0_34], %121 {strides = array<i32>} : memref<5x24x24xf32, #tpu.memory_space<vmem>>, vector<1x24x24xf32>,
    %122 = vector.extract_strided_slice %11 {offsets = [128, 0], sizes = [32, 24], strides = [1, 1]} : vector<160x24xf32> to vector<32x24xf32>
    %cst_35 = arith.constant dense<0.000000e+00> : vector<24x24xf32>
    %123 = tpu.matmul %2, %122, %cst_35 {dimension_numbers = #tpu.dot_dimension_numbers<[1], [0], [0], [1], [0, 0, 1, 1], [], []>} : vector<24x32xf32>, vector<32x24xf32>, vector<24x24xf32> -> vector<24x24xf32>
    %124 = vector.extract_strided_slice %1 {offsets = [128, 0], sizes = [32, 32], strides = [1, 1]} : vector<160x32xf32> to vector<32x32xf32>
    %cst_36 = arith.constant 0.000000e+00 : f32
    %125 = vector.broadcast %cst_36 : f32 to vector<32x32xf32>
    %126 = arith.select %14, %124, %125 : vector<32x32xi1>, vector<32x32xf32>
    %127 = vector.shape_cast %126 : vector<32x32xf32> to vector<1x32x32xf32>
    %cst_37 = arith.constant dense<0.000000e+00> : vector<1xf32>
    %128 = vector.multi_reduction <add>, %127, %cst_37 [1, 2] : vector<1x32x32xf32> to vector<1xf32>
    %129 = vector.shape_cast %128 : vector<1xf32> to vector<1x1x1xf32>
    %130 = vector.extract %129[0, 0, 0] : f32 from vector<1x1x1xf32>
    %131 = vector.extract_strided_slice %0 {offsets = [4, 0], sizes = [1, 32], strides = [1, 1]} : vector<5x32xf32> to vector<1x32xf32>
    %132 = vector.extract_strided_slice %0 {offsets = [4, 0], sizes = [1, 32], strides = [1, 1]} : vector<5x32xf32> to vector<1x32xf32>
    %133 = arith.mulf %131, %132 : vector<1x32xf32>
    %134 = vector.shape_cast %133 : vector<1x32xf32> to vector<1x1x32xf32>
    %cst_38 = arith.constant dense<0.000000e+00> : vector<1xf32>
    %135 = vector.multi_reduction <add>, %134, %cst_38 [1, 2] : vector<1x1x32xf32> to vector<1xf32>
    %136 = vector.shape_cast %135 : vector<1xf32> to vector<1x1x1xf32>
    %137 = vector.extract %136[0, 0, 0] : f32 from vector<1x1x1xf32>
    %138 = arith.addf %130, %137 : f32
    %139 = vector.broadcast %138 : f32 to vector<1x24xf32>
    %140 = arith.mulf %5, %139 : vector<1x24xf32>
    %141 = arith.addf %140, %6 : vector<1x24xf32>
    %142 = vector.broadcast %141 : vector<1x24xf32> to vector<24x24xf32>
    %143 = arith.addf %123, %142 : vector<24x24xf32>
    %144 = arith.select %17, %143, %123 : vector<24x24xi1>, vector<24x24xf32>
    %c4 = arith.constant 4 : index
    %c0_39 = arith.constant 0 : index
    %c0_40 = arith.constant 0 : index
    %145 = vector.load %arg6[%c4, %c0_39, %c0_40] : memref<5x24x24xf32, #tpu.memory_space<vmem>>, vector<1x24x24xf32>
    %146 = vector.shape_cast %145 : vector<1x24x24xf32> to vector<24x24xf32>
    %147 = vector.shape_cast %144 : vector<24x24xf32> to vector<1x24x24xf32>
    tpu.vector_store %arg6[%c4, %c0_39, %c0_40], %147 {strides = array<i32>} : memref<5x24x24xf32, #tpu.memory_space<vmem>>, vector<1x24x24xf32>,
    return
  }
  func.func @transform_0(%arg0: i32) -> (i32, i32) {
    %c0_i32 = arith.constant 0 : i32
    %c0_i32_0 = arith.constant 0 : i32
    return %arg0, %c0_i32 : i32, i32
  }
  func.func @transform_1(%arg0: i32) -> (i32, i32) {
    %c0_i32 = arith.constant 0 : i32
    %c0_i32_0 = arith.constant 0 : i32
    return %arg0, %c0_i32 : i32, i32
  }
  func.func @transform_2(%arg0: i32) -> (i32, i32) {
    %c0_i32 = arith.constant 0 : i32
    %c0_i32_0 = arith.constant 0 : i32
    %c0_i32_1 = arith.constant 0 : i32
    return %c0_i32, %c0_i32_0 : i32, i32
  }
  func.func @transform_3(%arg0: i32) -> (i32, i32) {
    %c0_i32 = arith.constant 0 : i32
    %c0_i32_0 = arith.constant 0 : i32
    %c0_i32_1 = arith.constant 0 : i32
    return %c0_i32, %c0_i32_0 : i32, i32
  }
  func.func @transform_4(%arg0: i32) -> (i32, i32) {
    %c0_i32 = arith.constant 0 : i32
    %c0_i32_0 = arith.constant 0 : i32
    return %arg0, %c0_i32 : i32, i32
  }
  func.func @transform_5(%arg0: i32) -> (i32, i32, i32) {
    %c0_i32 = arith.constant 0 : i32
    %c0_i32_0 = arith.constant 0 : i32
    %c0_i32_1 = arith.constant 0 : i32
    return %arg0, %c0_i32, %c0_i32_0 : i32, i32, i32
  }
}

</mosaic_0001>

<bundles_post_ra>
// kernel: vdp_fully_connected.1
= control target key start
LH: loop header
LB: loop body
LE: loop exit
PB: predicated region body
PF: predicated region fallthrough
CT: control target
= control target key end

     0   :  { %11 = vsyncpa [#allocation3], 0  ;;  %s1862_s0 = inlined_call_operand.vmem [shape: f32[5,32], index: 0, kind: input, shape index: {}]   ;;  %s1863_s1 = inlined_call_operand.hbm [shape: f32[160,32], index: 1, kind: input, shape index: {}]   ;;  %s1864_s2 = inlined_call_operand.hbm [shape: f32[24,32], index: 2, kind: input, shape index: {}]   ;;  %s1865_s3 = inlined_call_operand.vmem [shape: f32[3,24], index: 3, kind: input, shape index: {}]   ;;  %s1866_s4 = inlined_call_operand.hbm [shape: f32[5,24], index: 4, kind: output, shape index: {0}]   ;;  %s1867_s5 = inlined_call_operand.hbm [shape: f32[5,24,24], index: 5, kind: output, shape index: {1}]  }
   0x1   :  { %12 = vsyncpa [#allocation6], 0 }
   0x2   :  { %13 = vsyncpa [#allocation4], 0 }
   0x3   :  { %14 = vsyncpa [#allocation9], 0  ;;  %s1435_s18 = smov [#allocation2]  }
   0x4   :  { %s22_s19 = sshll.u32 %s1435_s18, 4  ;;  %s23_s19 = int_to_ptr.vmem [resolvable:$true] %s22_s19 }
   0x5   :  { %s1355_s20 = scalar_lea.vmem %s23_s19, 2560  ;;  %p1360_p1 = scmp.lt.s32.totalorder %s23_s19, %s23_s19 }
   0x6   :  { %p1356_p0 = scmp.ne.s32.totalorder %s23_s19, %s1355_s20  ;;  %p1361_p2 = scmp.lt.s32.totalorder %s1355_s20, %s1355_s20 }
   0x8   :  { %p1362_p3 = por %p1361_p2, %p1360_p1 }
   0xa   :  { %p1363_p4 = pnand %p1362_p3, %p1356_p0 }
   0xc   :  { %1366 = shalt.err (!%p1363_p4)
}
   0xd   :  { %s1436_s21 = smov 128   ;;  %s1437_s22 = smov 8  }
   0xe   :  { %28 = dma.hbm_to_vmem [thread:$0]  %s1863_s1, 2560, %s23_s19, [#allocation3], %s1436_s21, %s1436_s21, %s1437_s22  }
   0xf   :  { %s1438_s25 = smov [#allocation5]  }
  0x10   :  { %s34_s26 = sshll.u32 %s1438_s25, 4  ;;  %s35_s26 = int_to_ptr.vmem [resolvable:$true] %s34_s26 }
  0x11   :  { %s1375_s27 = scalar_lea.vmem %s35_s26, 384  ;;  %p1380_p6 = scmp.lt.s32.totalorder %s35_s26, %s35_s26 }
  0x12   :  { %p1376_p5 = scmp.ne.s32.totalorder %s35_s26, %s1375_s27  ;;  %p1381_p7 = scmp.lt.s32.totalorder %s1375_s27, %s1375_s27 }
  0x14   :  { %p1382_p8 = por %p1381_p7, %p1380_p6 }
  0x16   :  { %p1383_p9 = pnand %p1382_p8, %p1376_p5 }
  0x18   :  { %1386 = shalt.err (!%p1383_p9)
}
  0x19   :  { %40 = dma.hbm_to_vmem [thread:$0]  %s1864_s2, 384, %s35_s26, [#allocation6], %s1436_s21, %s1436_s21, %s1437_s22  }
  0x1a   :  { %1427 = dma.done.wait [#allocation3], 2560  }
  0x1b   :  { %1428 = vsyncadd [#allocation3], 4294964736 }
  0x1c   :  { %1429 = dma.done.wait [#allocation6], 384  }
  0x1d   :  { %1430 = vsyncadd [#allocation6], 4294966912  ;;  %v1439_v0 = vmov 0.0   ;;  %vm78_vm0 = vcmask 261120   ;;  %v1486_v1 = vld [vmem:[#allocation5 + $0x10] sm:$0xff]  ;;  %v1488_v2 = vld [vmem:[#allocation5 + $0x8] sm:$0xff]  ;;  %v74_v23 = vlaneseq }
  0x1e   :  { %1189 = vmatprep.subr.mxu0 %v1439_v0  ;;  %1198 = vmatprep.subr.msk.mxu1 %vm78_vm0, %v1486_v1  ;;  %v1492_v3 = vld [vmem:[#allocation2] sm:$0xff]  ;;  %v51_v5 = vld [vmem:[#allocation2 + $0x8] sm:$0xff]  ;;  %v52_v6 = vld [vmem:[#allocation2 + $0x10] sm:$0xff]  ;;  %vm500_vm4 = vcmask 253952   ;;  %vm1440_vm6 = vmmov 0   ;;  %vm161_vm7 = vcmask 192512  }
  0x1f   :  { %1190 = vmatpush3.xpose.msk.msra.mxu0 %vm78_vm0, %v1486_v1  ;;  %1199 = vmatpush3.xpose.msk.msra.mxu1 %vm78_vm0, %v1486_v1  ;;  %v1503_v4 = vld [vmem:[#allocation5] sm:$0xff]  ;;  %v53_v7 = vld [vmem:[#allocation2 + $0x18] sm:$0xff]  ;;  %v1525_v9 = vld [vmem:[#allocation2 + $0x28] sm:$0xff]  ;;  %v1583_v25 = vshrl.u32 %v74_v23, 7  ;;  %v394_v27 = vand.u32 127, %v74_v23  ;;  %s1441_s6 = smov [#allocation7]  }
  0x20   :  { %1204 = vmatprep.mubr.msk.f32.mxu1 %vm78_vm0, %v1492_v3  ;;  %1200 = vmatprep.subr.msk.mxu1 %vm78_vm0, %v1488_v2  ;;  %v1520_v8 = vld [vmem:[#allocation2 + $0x20] sm:$0xff]  ;;  %v1527_v10 = vld [vmem:[#allocation2 + $0x30] sm:$0xff]  ;;  %v1533_v11 = vld [vmem:[#allocation2 + $0x38] sm:$0xff]  ;;  %s1059_s7 = sshll.u32 %s1441_s6, 4  ;;  %s1060_s7 = int_to_ptr.vmem [resolvable:$true] %s1059_s7 }
  0x21   :  { %1191 = vmatprep.subr.mxu0 %v1439_v0  ;;  %v1535_v12 = vld [vmem:[#allocation2 + $0x40] sm:$0xff]  ;;  %v1541_v13 = vld [vmem:[#allocation2 + $0x48] sm:$0xff]  ;;  %v1543_v14 = vld [vmem:[#allocation2 + $0x50] sm:$0xff]  ;;  %v390_v26 = vadd.s32 8, %v1583_v25  ;;  %vm1589_vm1 = vcmp.eq.s32.totalorder %v1583_v25, %v394_v27  ;;  %v391_v30 = vadd.s32 16, %v1583_v25  ;;  %v392_v40 = vadd.s32 24, %v1583_v25  ;;  %1195 = vmatprep.mubr.msk.f32.mxu0 %vm1440_vm6, %v1439_v0  ;;  %p1392_p11 = scmp.lt.s32.totalorder %s1060_s7, %s1060_s7 }
  0x22   :  { %v1549_v15 = vld [vmem:[#allocation2 + $0x58] sm:$0xff]  ;;  %v1551_v16 = vld [vmem:[#allocation2 + $0x60] sm:$0xff]  ;;  %v1557_v17 = vld [vmem:[#allocation2 + $0x68] sm:$0xff]  ;;  %v479_v31 = vsel %vm1589_vm1, %v1492_v3, 0.0  ;;  %v612_v50 = vsel %vm1589_vm1, %v1520_v8, 0.0  ;;  %s1387_s8 = scalar_lea.vmem %s1060_s7, 128 }
  0x23   :  { %1192 = vmatpush3.xpose.msk.msra.mxu0 %vm78_vm0, %v1488_v2  ;;  %1201 = vmatpush3.xpose.msk.msra.mxu1 %vm78_vm0, %v1488_v2  ;;  %v1559_v18 = vld [vmem:[#allocation2 + $0x70] sm:$0xff]  ;;  %v1565_v19 = vld [vmem:[#allocation2 + $0x78] sm:$0xff]  ;;  %v1567_v20 = vld [vmem:[#allocation2 + $0x80] sm:$0xff]  ;;  %vm1593_vm2 = vcmp.eq.s32.totalorder %v390_v26, %v394_v27  ;;  %v483_v33 = vsel %vm78_vm0, %v479_v31, 0.0  ;;  %vm1605_vm3 = vcmp.eq.s32.totalorder %v391_v30, %v394_v27  ;;  %vm1619_vm5 = vcmp.eq.s32.totalorder %v392_v40, %v394_v27  ;;  %p1388_p10 = scmp.ne.s32.totalorder %s1060_s7, %s1387_s8  ;;  %p1393_p12 = scmp.lt.s32.totalorder %s1387_s8, %s1387_s8 }
  0x24   :  { %1193 = vmatprep.subr.mxu0 %v1439_v0  ;;  %1202 = vmatprep.subr.msk.mxu1 %vm78_vm0, %v1503_v4  ;;  %v1573_v21 = vld [vmem:[#allocation2 + $0x88] sm:$0xff]  ;;  %v1575_v22 = vld [vmem:[#allocation2 + $0x90] sm:$0xff]  ;;  %v1581_v24 = vld [vmem:[#allocation2 + $0x98] sm:$0xff]  ;;  %v480_v32 = vsel %vm1593_vm2, %v51_v5, 0.0  ;;  %v481_v37 = vsel %vm1605_vm3, %v52_v6, 0.0  ;;  %v482_v44 = vsel %vm1619_vm5, %v53_v7, 0.0 }
  0x25   :  { %v484_v34 = vsel %vm78_vm0, %v480_v32, 0.0  ;;  %v49_v38 = vld [vmem:[%s1862_s0] sm:$0x1f]  ;;  %v486_v43 = vsel %vm78_vm0, %v481_v37, 0.0  ;;  %v488_v47 = vsel %vm78_vm0, %v482_v44, 0.0  ;;  %v613_v51 = vsel %vm1593_vm2, %v1525_v9, 0.0  ;;  %p1394_p13 = por %p1393_p12, %p1392_p11 }
  0x26   :  { %v485_v36 = vadd.f32 %v484_v34, %v483_v33  ;;  %v1614_v39 = vmul.f32 %v49_v38, %v49_v38  ;;  %v616_v54 = vsel %vm78_vm0, %v612_v50, 0.0  ;;  %v617_v55 = vsel %vm78_vm0, %v613_v51, 0.0 }
  0x27   :  { %1194 = vmatpush3.xpose.msk.msra.mxu0 %vm78_vm0, %v1503_v4  ;;  %1203 = vmatpush3.xpose.msk.msra.mxu1 %vm78_vm0, %v1503_v4  ;;  %v614_v56 = vsel %vm1605_vm3, %v1527_v10, 0.0  ;;  %v618_v59 = vadd.f32 %v617_v55, %v616_v54  ;;  %v615_v61 = vsel %vm1619_vm5, %v1533_v11, 0.0  ;;  %v746_v23 = vsel %vm1619_vm5, %v1549_v15, 0.0  ;;  %p1395_p0 = pnand %p1394_p13, %p1388_p10 }
  0x28   :  { %1234 = vmatprep.subr.mxu0 %v1439_v0  ;;  %1285 = vmatprep.subr.mxu1 %v1439_v0  ;;  %v501_v41 = vsel %vm500_vm4, %v1614_v39, 0.0  ;;  %v487_v45 = vadd.f32 %v486_v43, %v485_v36  ;;  %v633_v46 = vrot.slane %v1614_v39, 1  ;;  %v763_v52 = vrot.slane %v1614_v39, 2 }
  0x29   :  { %502 = vadd.xlane.f32.xlu0 %v501_v41  ;;  %v893_v57 = vrot.slane %v1614_v39, 3  ;;  %v619_v60 = vsel %vm78_vm0, %v614_v56, 0.0  ;;  %v621_v63 = vsel %vm78_vm0, %v615_v61, 0.0  ;;  %v752_v30 = vsel %vm78_vm0, %v746_v23, 0.0 }
  0x2a   :  { %1205 = vmatmul.mubr.msk.f32.vlgmr.msra.gmra.mxu1 %vm78_vm0, %v51_v5  ;;  %v489_v48 = vadd.f32 %v488_v47, %v487_v45  ;;  %v635_v49 = vsel %vm500_vm4, %v633_v46, 0.0  ;;  %v765_v53 = vsel %vm500_vm4, %v763_v52, 0.0  ;;  %1196 = vmatmul.mubr.msk.f32.vlgmr.msra.gmra.mxu0 %vm78_vm0, %v49_v38  ;;  %v620_v62 = vadd.f32 %v619_v60, %v618_v59 }
  0x2b   :  { %1207 = vmatprep.mubr.msk.f32.mxu1 %vm78_vm0, %v52_v6  ;;  %636 = vadd.xlane.f32.xlu1 %v635_v49  ;;  %v895_v58 = vsel %vm500_vm4, %v893_v57, 0.0  ;;  %v743_v5 = vsel %vm1589_vm1, %v1535_v12, 0.0  ;;  %v744_v6 = vsel %vm1593_vm2, %v1541_v13, 0.0  ;;  %v876_v34 = vsel %vm1619_vm5, %v1565_v19, 0.0 }
  0x2c   :  { %1242 = vmatprep.mubr.msk.f32.mxu0 %vm1440_vm6, %v1439_v0  ;;  %v622_v3 = vadd.f32 %v621_v63, %v620_v62  ;;  %v882_v38 = vsel %vm78_vm0, %v876_v34, 0.0  ;;  %v1023_v44 = vrot.slane %v1614_v39, 4 }
  0x2d   :  { %490 = vadd.xlane.f32.xlu0 %v489_v48 }
  0x2e   :  { %1208 = vmatmul.mubr.msk.f32.gmra.mxu1 %vm78_vm0, %v53_v7  ;;  %v747_v7 = vsel %vm78_vm0, %v743_v5, 0.0  ;;  %v1025_v47 = vsel %vm500_vm4, %v1023_v44, 0.0 }
  0x2f   :  { %1210 = vmatprep.mubr.msk.f32.mxu1 %vm78_vm0, %v1520_v8  ;;  %766 = vadd.xlane.f32.xlu1 %v765_v53  ;;  %v748_v8 = vsel %vm78_vm0, %v744_v6, 0.0 }
  0x32   :  { %1211 = vmatmul.mubr.msk.f32.gmra.mxu1 %vm78_vm0, %v1525_v9  ;;  %v745_v9 = vsel %vm1605_vm3, %v1543_v14, 0.0 }
  0x33   :  { %1213 = vmatprep.mubr.msk.f32.mxu1 %vm78_vm0, %v1527_v10  ;;  %896 = vadd.xlane.f32.xlu1 %v895_v58  ;;  %v873_v10 = vsel %vm1589_vm1, %v1551_v16, 0.0 }
  0x34   :  { %v877_v27 = vsel %vm78_vm0, %v873_v10, 0.0 }
  0x36   :  { %1214 = vmatmul.mubr.msk.f32.gmra.mxu1 %vm78_vm0, %v1533_v11  ;;  %v874_v11 = vsel %vm1593_vm2, %v1557_v17, 0.0 }
  0x37   :  { %1216 = vmatprep.mubr.msk.f32.mxu1 %vm78_vm0, %v1535_v12  ;;  %623 = vadd.xlane.f32.xlu1 %v622_v3  ;;  %v749_v12 = vadd.f32 %v748_v8, %v747_v7 }
  0x3a   :  { %1217 = vmatmul.mubr.msk.f32.gmra.mxu1 %vm78_vm0, %v1541_v13  ;;  %v750_v13 = vsel %vm78_vm0, %v745_v9, 0.0 }
  0x3b   :  { %1219 = vmatprep.mubr.msk.f32.mxu1 %vm78_vm0, %v1543_v14  ;;  %v751_v26 = vadd.f32 %v750_v13, %v749_v12  ;;  %v878_v14 = vsel %vm78_vm0, %v874_v11, 0.0  ;;  %1026 = vadd.xlane.f32.xlu1 %v1025_v47 }
  0x3c   :  { %v879_v32 = vadd.f32 %v878_v14, %v877_v27 }
  0x3d   :  { %v753_v31 = vadd.f32 %v752_v30, %v751_v26 }
  0x3e   :  { %1220 = vmatmul.mubr.msk.f32.gmra.mxu1 %vm78_vm0, %v1549_v15  ;;  %v1004_v15 = vsel %vm1593_vm2, %v1573_v21, 0.0 }
  0x3f   :  { %1222 = vmatprep.mubr.msk.f32.mxu1 %vm78_vm0, %v1551_v16  ;;  %v875_v16 = vsel %vm1605_vm3, %v1559_v18, 0.0  ;;  %754 = vadd.xlane.f32.xlu0 %v753_v31  ;;  %v1008_v37 = vsel %vm78_vm0, %v1004_v15, 0.0 }
  0x40   :  { %v880_v33 = vsel %vm78_vm0, %v875_v16, 0.0 }
  0x41   :  { %v881_v36 = vadd.f32 %v880_v33, %v879_v32 }
  0x42   :  { %1223 = vmatmul.mubr.msk.f32.gmra.mxu1 %vm78_vm0, %v1557_v17  ;;  %v1003_v17 = vsel %vm1589_vm1, %v1567_v20, 0.0 }
  0x43   :  { %1225 = vmatprep.mubr.msk.f32.mxu1 %vm78_vm0, %v1559_v18  ;;  %v1007_v18 = vsel %vm78_vm0, %v1003_v17, 0.0 }
  0x44   :  { %v1009_v40 = vadd.f32 %v1008_v37, %v1007_v18 }
  0x46   :  { %1226 = vmatmul.mubr.msk.f32.gmra.mxu1 %vm78_vm0, %v1565_v19  ;;  %v1006_v19 = vsel %vm1619_vm5, %v1581_v24, 0.0 }
  0x47   :  { %1228 = vmatprep.mubr.msk.f32.mxu1 %vm78_vm0, %v1567_v20  ;;  %v1005_v20 = vsel %vm1605_vm3, %v1575_v22, 0.0  ;;  %v1012_v45 = vsel %vm78_vm0, %v1006_v19, 0.0 }
  0x48   :  { %v1010_v41 = vsel %vm78_vm0, %v1005_v20, 0.0 }
  0x49   :  { %v1011_v43 = vadd.f32 %v1010_v41, %v1009_v40 }
  0x4a   :  { %1229 = vmatmul.mubr.msk.f32.gmra.mxu1 %vm78_vm0, %v1573_v21  ;;  %v883_v21 = vadd.f32 %v882_v38, %v881_v36 }
  0x4b   :  { %1231 = vmatprep.mubr.msk.f32.mxu1 %vm78_vm0, %v1575_v22  ;;  %v1013_v46 = vadd.f32 %v1012_v45, %v1011_v43 }
  0x4c   :  { %884 = vadd.xlane.f32.xlu0 %v883_v21 }
  0x4e   :  { %1232 = vmatmul.mubr.msk.f32.gmra.mxu1 %vm78_vm0, %v1581_v24 }
  0x4f   :  { %1293 = vmatprep.mubr.msk.f32.mxu1 %vm1440_vm6, %v1439_v0 }
  0x50   :  { %1014 = vadd.xlane.f32.xlu0 %v1013_v46 }
  0xb2   :  { %v503_v48 = vpop.xlane.xlu0 %502 }
  0xb3   :  { %v504_v50 = vrot.slane %v503_v48, 4 }
  0xb4   :  { %v637_v53 = vpop.xlane.xlu1 %636 }
  0xb5   :  { %v505_v52 = vadd.f32 %v504_v50, %v503_v48  ;;  %v638_v56 = vrot.slane %v637_v53, 4 }
  0xb6   :  { %v491_v42 = vpop.xlane.xlu0 %490 }
  0xb7   :  { %v506_v39 = vrot.slane %v505_v52, 2  ;;  %v492_v54 = vrot.slane %v491_v42, 4  ;;  %v639_v3 = vadd.f32 %v638_v56, %v637_v53 }
  0xb8   :  { %v767_v59 = vpop.xlane.xlu1 %766 }
  0xb9   :  { %v493_v57 = vadd.f32 %v492_v54, %v491_v42  ;;  %v507_v58 = vadd.f32 %v506_v39, %v505_v52  ;;  %v640_v11 = vrot.slane %v639_v3, 2  ;;  %v768_v14 = vrot.slane %v767_v59, 4 }
  0xbb   :  { %v494_v61 = vrot.slane %v493_v57, 2  ;;  %v508_v62 = vrot.slane %v507_v58, 1  ;;  %v641_v30 = vadd.f32 %v640_v11, %v639_v3  ;;  %v769_v32 = vadd.f32 %v768_v14, %v767_v59 }
  0xbc   :  { %v897_v6 = vpop.xlane.xlu1 %896 }
  0xbd   :  { %v495_v5 = vadd.f32 %v494_v61, %v493_v57  ;;  %v509_v9 = vadd.f32 %v508_v62, %v507_v58  ;;  %v642_v33 = vrot.slane %v641_v30, 1  ;;  %v898_v18 = vrot.slane %v897_v6, 4 }
  0xbe   :  { %v770_v20 = vrot.slane %v769_v32, 2 }
  0xbf   :  { %v496_v8 = vrot.slane %v495_v5, 1  ;;  %v643_v21 = vadd.f32 %v642_v33, %v641_v30  ;;  %v899_v19 = vadd.f32 %v898_v18, %v897_v6  ;;  %v1784_v30 = vld [vmem:[%s1865_s3] sm:$0x7] }
  0xc0   :  { %v624_v23 = vpop.xlane.xlu1 %623  ;;  %v771_v46 = vadd.f32 %v770_v20, %v769_v32 }
  0xc1   :  { %v497_v12 = vadd.f32 %v496_v8, %v495_v5  ;;  %v625_v26 = vrot.slane %v624_v23, 4  ;;  %v900_v48 = vrot.slane %v899_v19, 2 }
  0xc2   :  { %v772_v52 = vrot.slane %v771_v46, 1 }
  0xc3   :  { %1319 = vpush %v497_v12  ;;  %v626_v16 = vadd.f32 %v625_v26, %v624_v23  ;;  %v901_v39 = vadd.f32 %v900_v48, %v899_v19 }
  0xc4   :  { %1321 = vpush %v509_v9  ;;  %v773_v56 = vadd.f32 %v772_v52, %v771_v46  ;;  %v1027_v59 = vpop.xlane.xlu1 %1026 }
  0xc5   :  { %v627_v17 = vrot.slane %v626_v16, 2  ;;  %v902_v61 = vrot.slane %v901_v39, 1  ;;  %v1028_v62 = vrot.slane %v1027_v59, 4 }
  0xc7   :  { %v628_v34 = vadd.f32 %v627_v17, %v626_v16  ;;  %v1029_v5 = vadd.f32 %v1028_v62, %v1027_v59  ;;  %v903_v8 = vadd.f32 %v902_v61, %v901_v39 }
  0xc8   :  { %v755_v43 = vpop.xlane.xlu0 %754 }
  0xc9   :  { %v629_v37 = vrot.slane %v628_v34, 1  ;;  %v756_v44 = vrot.slane %v755_v43, 4  ;;  %v1030_v9 = vrot.slane %v1029_v5, 2 }
  0xcb   :  { %v630_v40 = vadd.f32 %v629_v37, %v628_v34  ;;  %v757_v47 = vadd.f32 %v756_v44, %v755_v43  ;;  %v1031_v12 = vadd.f32 %v1030_v9, %v1029_v5 }
  0xcd   :  { %1323 = vpush %v630_v40  ;;  %v1032_v26 = vrot.slane %v1031_v12, 1 }
  0xce   :  { %1325 = vpush %v643_v21 }
  0xcf   :  { %v1033_v14 = vadd.f32 %v1032_v26, %v1031_v12 }
  0xea   :  { %v1206_v22 = vpop.f32.mrf.mxu1 }
  0xec   :  { %v289_v49 = vpop.f32.mrf.mxu1 }
  0xee   :  { %v1209_v51 = vpop.f32.mrf.mxu1 }
  0xef   :  { %1235 = vmatpush3.msra.mxu0 %v1209_v51  ;;  %v885_v51 = vpop.xlane.xlu0 %884 }
  0xf0   :  { %v299_v24 = vpop.f32.mrf.mxu1  ;;  %1236 = vmatprep.subr.mxu0 %v1439_v0  ;;  %v886_v53 = vrot.slane %v885_v51, 4 }
  0xf1   :  { %1237 = vmatpush3.msra.mxu0 %v299_v24 }
  0xf2   :  { %v1212_v55 = vpop.f32.mrf.mxu1  ;;  %1238 = vmatprep.subr.mxu0 %v1439_v0  ;;  %v887_v54 = vadd.f32 %v886_v53, %v885_v51 }
  0xf3   :  { %1239 = vmatpush3.msra.mxu0 %v1206_v22 }
  0xf4   :  { %v309_v60 = vpop.f32.mrf.mxu1  ;;  %1240 = vmatprep.subr.mxu0 %v1439_v0  ;;  %v888_v57 = vrot.slane %v887_v54, 2 }
  0xf5   :  { %1241 = vmatpush3.msra.mxu0 %v289_v49  ;;  %v758_v49 = vrot.slane %v757_v47, 2 }
  0xf6   :  { %v1215_v63 = vpop.f32.mrf.mxu1  ;;  %1243 = vmatmul.mubr.msk.f32.vlgmr.msra.gmra.mxu0 %vm78_vm0, %v1503_v4  ;;  %1251 = vmatprep.subr.mxu0 %v1439_v0  ;;  %v889_v3 = vadd.f32 %v888_v57, %v887_v54 }
  0xf7   :  { %1252 = vmatpush3.msra.mxu0 %v1215_v63  ;;  %1245 = vmatprep.mubr.msk.f32.mxu0 %vm1440_vm6, %v1439_v0  ;;  %v759_v42 = vadd.f32 %v758_v49, %v757_v47 }
  0xf8   :  { %v319_v7 = vpop.f32.mrf.mxu1  ;;  %1253 = vmatprep.subr.mxu0 %v1439_v0 }
  0xf9   :  { %1254 = vmatpush3.msra.mxu0 %v319_v7  ;;  %v890_v7 = vrot.slane %v889_v3, 1 }
  0xfa   :  { %v1218_v10 = vpop.f32.mrf.mxu1  ;;  %1246 = vmatmul.mubr.msk.f32.gmra.mxu0 %vm78_vm0, %v1488_v2  ;;  %1255 = vmatprep.subr.mxu0 %v1439_v0 }
  0xfb   :  { %1256 = vmatpush3.msra.mxu0 %v1212_v55  ;;  %1248 = vmatprep.mubr.msk.f32.mxu0 %vm1440_vm6, %v1439_v0  ;;  %v760_v55 = vrot.slane %v759_v42, 1  ;;  %v891_v11 = vadd.f32 %v890_v7, %v889_v3 }
  0xfc   :  { %v329_v13 = vpop.f32.mrf.mxu1  ;;  %1257 = vmatprep.subr.mxu0 %v1439_v0 }
  0xfd   :  { %1258 = vmatpush3.msra.mxu0 %v309_v60  ;;  %v761_v58 = vadd.f32 %v760_v55, %v759_v42  ;;  %v1015_v60 = vpop.xlane.xlu0 %1014 }
  0xfe   :  { %v1221_v27 = vpop.f32.mrf.mxu1  ;;  %1249 = vmatmul.mubr.msk.f32.gmra.mxu0 %vm78_vm0, %v1486_v1  ;;  %1268 = vmatprep.subr.mxu0 %v1439_v0  ;;  %v1016_v63 = vrot.slane %v1015_v60, 4 }
  0xff   :  { %1259 = vmatprep.mubr.msk.f32.mxu0 %vm1440_vm6, %v1439_v0  ;;  %1327 = vpush %v761_v58 }
 0x100   :  { %v339_v31 = vpop.f32.mrf.mxu1  ;;  %1329 = vpush %v773_v56  ;;  %v1017_v6 = vadd.f32 %v1016_v63, %v1015_v60 }
 0x101   :  { %1331 = vpush %v891_v11 }
 0x102   :  { %v1224_v15 = vpop.f32.mrf.mxu1  ;;  %1260 = vmatmul.mubr.msk.f32.vlgmr.msra.gmra.mxu0 %vm78_vm0, %v1503_v4  ;;  %1333 = vpush %v903_v8 }
 0x103   :  { %1269 = vmatpush3.msra.mxu0 %v1221_v27  ;;  %1262 = vmatprep.mubr.msk.f32.mxu0 %vm1440_vm6, %v1439_v0 }
 0x104   :  { %1270 = vmatprep.subr.mxu0 %v1439_v0  ;;  %v349_v36 = vpop.f32.mrf.mxu1 }
 0x105   :  { %1271 = vmatpush3.msra.mxu0 %v339_v31 }
 0x106   :  { %1272 = vmatprep.subr.mxu0 %v1439_v0  ;;  %v1227_v38 = vpop.f32.mrf.mxu1  ;;  %1263 = vmatmul.mubr.msk.f32.gmra.mxu0 %vm78_vm0, %v1488_v2 }
 0x107   :  { %1273 = vmatpush3.msra.mxu0 %v1218_v10  ;;  %1286 = vmatpush3.msra.mxu1 %v1227_v38  ;;  %v1018_v10 = vrot.slane %v1017_v6, 2 }
 0x108   :  { %1274 = vmatprep.subr.mxu0 %v1439_v0  ;;  %v359_v41 = vpop.f32.mrf.mxu1  ;;  %1287 = vmatprep.subr.mxu1 %v1439_v0 }
 0x109   :  { %1275 = vmatpush3.msra.mxu0 %v329_v13  ;;  %1288 = vmatpush3.msra.mxu1 %v359_v41  ;;  %v1019_v13 = vadd.f32 %v1018_v10, %v1017_v6 }
 0x10a   :  { %1289 = vmatprep.subr.mxu1 %v1439_v0  ;;  %v1230_v45 = vpop.f32.mrf.mxu1  ;;  %1265 = vmatprep.mubr.msk.f32.mxu0 %vm1440_vm6, %v1439_v0 }
 0x10b   :  { %1290 = vmatpush3.msra.mxu1 %v1224_v15  ;;  %1266 = vmatmul.mubr.msk.f32.gmra.mxu0 %vm78_vm0, %v1486_v1  ;;  %v1020_v23 = vrot.slane %v1019_v13, 1 }
 0x10c   :  { %1291 = vmatprep.subr.mxu1 %v1439_v0  ;;  %v369_v22 = vpop.f32.mrf.mxu1  ;;  %1276 = vmatprep.mubr.msk.f32.mxu0 %vm1440_vm6, %v1439_v0 }
 0x10d   :  { %1292 = vmatpush3.msra.mxu1 %v349_v36  ;;  %1302 = vmatprep.subr.mxu0 %v1439_v0  ;;  %v1021_v27 = vadd.f32 %v1020_v23, %v1019_v13 }
 0x10e   :  { %v1233_v50 = vpop.f32.mrf.mxu1  ;;  %1294 = vmatmul.mubr.msk.f32.vlgmr.msra.gmra.mxu1 %vm78_vm0, %v1503_v4 }
 0x10f   :  { %1277 = vmatmul.mubr.msk.f32.vlgmr.msra.gmra.mxu0 %vm78_vm0, %v1503_v4  ;;  %1296 = vmatprep.mubr.msk.f32.mxu1 %vm1440_vm6, %v1439_v0  ;;  %1335 = vpush %v1021_v27 }
 0x110   :  { %1303 = vmatpush3.msra.mxu0 %v1233_v50  ;;  %v379_v24 = vpop.f32.mrf.mxu1  ;;  %1279 = vmatprep.mubr.msk.f32.mxu0 %vm1440_vm6, %v1439_v0  ;;  %1337 = vpush %v1033_v14 }
 0x111   :  { %1304 = vmatprep.subr.mxu0 %v1439_v0 }
 0x112   :  { %1305 = vmatpush3.msra.mxu0 %v379_v24  ;;  %1297 = vmatmul.mubr.msk.f32.gmra.mxu1 %vm78_vm0, %v1488_v2 }
 0x113   :  { %1306 = vmatprep.subr.mxu0 %v1439_v0  ;;  %1280 = vmatmul.mubr.msk.f32.gmra.mxu0 %vm78_vm0, %v1488_v2 }
 0x114   :  { %1307 = vmatpush3.msra.mxu0 %v1230_v45  ;;  %1282 = vmatprep.mubr.msk.f32.mxu0 %vm1440_vm6, %v1439_v0 }
 0x115   :  { %1308 = vmatprep.subr.mxu0 %v1439_v0  ;;  %1299 = vmatprep.mubr.msk.f32.mxu1 %vm1440_vm6, %v1439_v0 }
 0x116   :  { %1309 = vmatpush3.msra.mxu0 %v369_v22  ;;  %1300 = vmatmul.mubr.msk.f32.gmra.mxu1 %vm78_vm0, %v1486_v1 }
 0x117   :  { %1283 = vmatmul.mubr.msk.f32.gmra.mxu0 %vm78_vm0, %v1486_v1 }
 0x118   :  { %1310 = vmatprep.mubr.msk.f32.mxu0 %vm1440_vm6, %v1439_v0 }
 0x11b   :  { %1311 = vmatmul.mubr.msk.f32.vlgmr.msra.gmra.mxu0 %vm78_vm0, %v1503_v4  ;;  %v76_v4 = vsub.s32 0, %v1583_v25 }
 0x11c   :  { %1313 = vmatprep.mubr.msk.f32.mxu0 %vm1440_vm6, %v1439_v0 }
 0x11d   :  { %v77_v16 = vrot.slane %v1784_v30, %v76_v4 }
 0x11f   :  { %1314 = vmatmul.mubr.msk.f32.gmra.mxu0 %vm78_vm0, %v1488_v2  ;;  %v157_v2 = vpop.f32.mrf.mxu0 }
 0x120   :  { %1316 = vmatprep.mubr.msk.f32.mxu0 %vm1440_vm6, %v1439_v0  ;;  %v158_v31 = vadd.f32 %v157_v2, %v77_v16 }
 0x121   :  { %v1197_v17 = vpop.f32.mrf.mxu0 }
 0x122   :  { %162 = vst.msk [vmem:[#allocation7] sm:$0x1f] %vm161_vm7, %v158_v31 }
 0x123   :  { %1317 = vmatmul.mubr.msk.f32.gmra.mxu0 %vm78_vm0, %v1486_v1 }
 0x124   :  { %1398 = shalt.err (!%p1395_p0)
}
 0x125   :  { %1062 = dma.vmem_to_hbm [thread:$0]  %s1060_s7, 128, %s1866_s4, [#allocation4]   ;;  %v1792_v15 = vrot.slane %v1784_v30, 1  ;;  %v1796_v33 = vsub.s32 1, %v1583_v25  ;;  %vm528_vm8 = vcmask 195584  }
 0x126   :  { %s1320_s10 = spop %1319  ;;  %s1442_s26 = smov [#allocation8]  }
 0x127   :  { %s1322_s11 = spop %1321  ;;  %s1068_s27 = sshll.u32 %s1442_s26, 4  ;;  %s1069_s27 = int_to_ptr.vmem [resolvable:$true] %s1068_s27 }
 0x128   :  { %s511_s12 = sadd.f32 %s1322_s11, %s1320_s10  ;;  %s1324_s13 = spop %1323 }
 0x129   :  { %s1326_s14 = spop %1325  ;;  %s1407_s28 = scalar_lea.vmem %s1069_s27, 1920 }
 0x12a   :  { %v512_v0 = vstv %s511_s12  ;;  %s645_s15 = sadd.f32 %s1326_s14, %s1324_s13  ;;  %p1408_p1 = scmp.ne.s32.totalorder %s1069_s27, %s1407_s28 }
 0x12b   :  { %v513_v1 = vmul.f32 %v512_v0, %v1784_v30  ;;  %p1412_p2 = scmp.lt.s32.totalorder %s1069_s27, %s1069_s27  ;;  %p1413_p3 = scmp.lt.s32.totalorder %s1407_s28, %s1407_s28 }
 0x12c   :  { %v646_v36 = vstv %s645_s15 }
 0x12d   :  { %v517_v32 = vadd.f32 %v1792_v15, %v513_v1  ;;  %v647_v38 = vmul.f32 %v646_v36, %v1784_v30  ;;  %p1414_p4 = por %p1413_p3, %p1412_p2 }
 0x12f   :  { %v521_v34 = vrot.slane %v517_v32, %v1796_v33  ;;  %v648_v41 = vadd.f32 %v647_v38, %v1792_v15  ;;  %p1415_p5 = pnand %p1414_p4, %p1408_p1 }
 0x130   :  { %s1328_s4 = spop %1327 }
 0x131   :  { %s1330_s16 = spop %1329  ;;  %v652_v45 = vrot.slane %v648_v41, %v1796_v33 }
 0x132   :  { %s1332_s17 = spop %1331  ;;  %s775_s20 = sadd.f32 %s1330_s16, %s1328_s4 }
 0x133   :  { %s1334_s18 = spop %1333 }
 0x134   :  { %s905_s19 = sadd.f32 %s1334_s18, %s1332_s17  ;;  %v776_v49 = vstv %s775_s20 }
 0x135   :  { %v777_v42 = vmul.f32 %v776_v49, %v1784_v30 }
 0x136   :  { %v906_v22 = vstv %s905_s19 }
 0x137   :  { %v907_v52 = vmul.f32 %v906_v22, %v1784_v30  ;;  %v778_v57 = vadd.f32 %v777_v42, %v1792_v15 }
 0x139   :  { %v908_v55 = vadd.f32 %v907_v52, %v1792_v15  ;;  %v782_v61 = vrot.slane %v778_v57, %v1796_v33 }
 0x13b   :  { %v912_v60 = vrot.slane %v908_v55, %v1796_v33 }
 0x140   :  { %s1336_s23 = spop %1335 }
 0x141   :  { %s1338_s24 = spop %1337 }
 0x142   :  { %s1035_s25 = sadd.f32 %s1338_s24, %s1336_s23 }
 0x144   :  { %v1036_v3 = vstv %s1035_s25 }
 0x145   :  { %v1037_v11 = vmul.f32 %v1036_v3, %v1784_v30 }
 0x147   :  { %v1038_v16 = vadd.f32 %v1037_v11, %v1792_v15 }
 0x1b6   :  { %v465_v18 = vpop.f32.mrf.mxu0 }
 0x1b7   :  { %v522_v37 = vadd.f32 %v521_v34, %v465_v18 }
 0x1b8   :  { %v1244_v20 = vpop.f32.mrf.mxu0 }
 0x1b9   :  { %v525_v21 = vsel %vm1589_vm1, %v522_v37, %v465_v18 }
 0x1ba   :  { %529 = vst.msk [vmem:[#allocation8] sm:$0xff] %vm528_vm8, %v525_v21  ;;  %v470_v25 = vpop.f32.mrf.mxu0 }
 0x1bb   :  { %v523_v40 = vadd.f32 %v521_v34, %v470_v25 }
 0x1bc   :  { %v1247_v19 = vpop.f32.mrf.mxu0 }
 0x1bd   :  { %v526_v43 = vsel %vm1593_vm2, %v523_v40, %v470_v25 }
 0x1be   :  { %530 = vst.msk [vmem:[#allocation8 + $0x8] sm:$0xff] %vm528_vm8, %v526_v43  ;;  %v475_v44 = vpop.f32.mrf.mxu0 }
 0x1bf   :  { %v524_v46 = vadd.f32 %v521_v34, %v475_v44  ;;  %v1042_v34 = vrot.slane %v1038_v16, %v1796_v33 }
 0x1c0   :  { %v1250_v47 = vpop.f32.mrf.mxu0 }
 0x1c1   :  { %v527_v48 = vsel %vm1605_vm3, %v524_v46, %v475_v44 }
 0x1c2   :  { %531 = vst.msk [vmem:[#allocation8 + $0x10] sm:$0xff] %vm528_vm8, %v527_v48  ;;  %v598_v50 = vpop.f32.mrf.mxu0 }
 0x1c3   :  { %v653_v51 = vadd.f32 %v652_v45, %v598_v50 }
 0x1c4   :  { %v1261_v53 = vpop.f32.mrf.mxu0 }
 0x1c5   :  { %v656_v24 = vsel %vm1589_vm1, %v653_v51, %v598_v50 }
 0x1c6   :  { %660 = vst.msk [vmem:[#allocation8 + $0x18] sm:$0xff] %vm528_vm8, %v656_v24  ;;  %v603_v39 = vpop.f32.mrf.mxu0 }
 0x1c7   :  { %v654_v54 = vadd.f32 %v652_v45, %v603_v39 }
 0x1c8   :  { %v1264_v56 = vpop.f32.mrf.mxu0 }
 0x1c9   :  { %v657_v58 = vsel %vm1593_vm2, %v654_v54, %v603_v39 }
 0x1ca   :  { %661 = vst.msk [vmem:[#allocation8 + $0x20] sm:$0xff] %vm528_vm8, %v657_v58 }
 0x1cb   :  { %v608_v59 = vpop.f32.mrf.mxu0 }
 0x1cc   :  { %v655_v62 = vadd.f32 %v652_v45, %v608_v59 }
 0x1cd   :  { %v1267_v63 = vpop.f32.mrf.mxu0 }
 0x1ce   :  { %v658_v5 = vsel %vm1605_vm3, %v655_v62, %v608_v59  ;;  %v859_v6 = vpop.f32.mrf.mxu1 }
 0x1cf   :  { %662 = vst.msk [vmem:[#allocation8 + $0x28] sm:$0xff] %vm528_vm8, %v658_v5  ;;  %v729_v7 = vpop.f32.mrf.mxu0  ;;  %v913_v8 = vadd.f32 %v912_v60, %v859_v6 }
 0x1d0   :  { %v783_v9 = vadd.f32 %v782_v61, %v729_v7  ;;  %v1295_v10 = vpop.f32.mrf.mxu1 }
 0x1d1   :  { %v1278_v12 = vpop.f32.mrf.mxu0  ;;  %v916_v13 = vsel %vm1589_vm1, %v913_v8, %v859_v6 }
 0x1d2   :  { %v786_v23 = vsel %vm1589_vm1, %v783_v9, %v729_v7  ;;  %920 = vst.msk [vmem:[#allocation8 + $0x48] sm:$0xff] %vm528_vm8, %v916_v13  ;;  %v864_v26 = vpop.f32.mrf.mxu1 }
 0x1d3   :  { %790 = vst.msk [vmem:[#allocation8 + $0x30] sm:$0xff] %vm528_vm8, %v786_v23  ;;  %v734_v27 = vpop.f32.mrf.mxu0  ;;  %v914_v14 = vadd.f32 %v912_v60, %v864_v26 }
 0x1d4   :  { %v784_v4 = vadd.f32 %v782_v61, %v734_v27  ;;  %v1298_v2 = vpop.f32.mrf.mxu1 }
 0x1d5   :  { %v1281_v31 = vpop.f32.mrf.mxu0  ;;  %v917_v30 = vsel %vm1593_vm2, %v914_v14, %v864_v26 }
 0x1d6   :  { %v787_v17 = vsel %vm1593_vm2, %v784_v4, %v734_v27  ;;  %921 = vst.msk [vmem:[#allocation8 + $0x50] sm:$0xff] %vm528_vm8, %v917_v30  ;;  %v869_v0 = vpop.f32.mrf.mxu1 }
 0x1d7   :  { %791 = vst.msk [vmem:[#allocation8 + $0x38] sm:$0xff] %vm528_vm8, %v787_v17  ;;  %v739_v1 = vpop.f32.mrf.mxu0  ;;  %v915_v32 = vadd.f32 %v912_v60, %v869_v0 }
 0x1d8   :  { %v785_v36 = vadd.f32 %v782_v61, %v739_v1  ;;  %v1301_v18 = vpop.f32.mrf.mxu1 }
 0x1d9   :  { %v1284_v15 = vpop.f32.mrf.mxu0  ;;  %v918_v37 = vsel %vm1605_vm3, %v915_v32, %v869_v0 }
 0x1da   :  { %v788_v38 = vsel %vm1605_vm3, %v785_v36, %v739_v1  ;;  %922 = vst.msk [vmem:[#allocation8 + $0x58] sm:$0xff] %vm528_vm8, %v918_v37 }
 0x1db   :  { %792 = vst.msk [vmem:[#allocation8 + $0x40] sm:$0xff] %vm528_vm8, %v788_v38  ;;  %v989_v20 = vpop.f32.mrf.mxu0 }
 0x1dc   :  { %v1043_v21 = vadd.f32 %v1042_v34, %v989_v20 }
 0x1dd   :  { %v1312_v25 = vpop.f32.mrf.mxu0 }
 0x1de   :  { %v1046_v40 = vsel %vm1589_vm1, %v1043_v21, %v989_v20 }
 0x1df   :  { %1050 = vst.msk [vmem:[#allocation8 + $0x60] sm:$0xff] %vm528_vm8, %v1046_v40  ;;  %v994_v33 = vpop.f32.mrf.mxu0 }
 0x1e0   :  { %v1044_v41 = vadd.f32 %v1042_v34, %v994_v33 }
 0x1e1   :  { %v1315_v19 = vpop.f32.mrf.mxu0 }
 0x1e2   :  { %v1047_v43 = vsel %vm1593_vm2, %v1044_v41, %v994_v33 }
 0x1e3   :  { %1051 = vst.msk [vmem:[#allocation8 + $0x68] sm:$0xff] %vm528_vm8, %v1047_v43  ;;  %v999_v44 = vpop.f32.mrf.mxu0 }
 0x1e4   :  { %v1045_v45 = vadd.f32 %v1042_v34, %v999_v44 }
 0x1e5   :  { %v1318_v46 = vpop.f32.mrf.mxu0 }
 0x1e6   :  { %v1048_v28 = vsel %vm1605_vm3, %v1045_v45, %v999_v44 }
 0x1e7   :  { %1052 = vst.msk [vmem:[#allocation8 + $0x70] sm:$0xff] %vm528_vm8, %v1048_v28 }
 0x1e8   :  { %1418 = shalt.err (!%p1415_p5)
}
 0x1e9   :  { %1074 = dma.vmem_to_hbm [thread:$0]  %s1069_s27, 1920, %s1867_s5, [#allocation9], %s1436_s21, %s1436_s21, %s1437_s22  }
 0x1ea   :  { %1431 = dma.done.wait [#allocation4], 128  }
 0x1eb   :  { %1432 = vsyncadd [#allocation4], 4294967168 }
 0x1ec   :  { %1433 = dma.done.wait [#allocation9], 1920  }
 0x1ed   :  { %1434 = vsyncadd [#allocation9], 4294965376 }
 0x1ee   :  { %1081 = vsyncpa [#allocation3], 1 }
 0x1ef   :  { %1082 = vsyncpa [#allocation6], 1 }
 0x1f0   :  { %1083 = vsyncpa [#allocation4], 1 }
 0x1f1   :  { %1084 = vsyncpa [#allocation9], 1 }

</bundles_post_ra>
